<compile_context>
chip_gen: v7x
topology: tpu7x:2x2x1
jax: 0.10.0
libtpu: 0.0.40
codegen_flags: <defaults>
</compile_context>

<pallas_src>
import jax
import jax.numpy as jnp
from jax.experimental import pallas as pl
from jax.experimental.pallas import tpu as pltpu

_MIB = 1024 * 1024


# ---------------------------------------------------------------------------
# Kernel: one (tm, d_model) row tile  x  one tk-wide d_ff chunk.
# Grid = (row_tiles ["parallel"], d_ff_chunks ["arbitrary"]).
# ---------------------------------------------------------------------------
def _ffn_kernel(x_ref, w1_ref, b1_ref, w2_ref, b2_ref, o_ref, acc_ref):
    k = pl.program_id(1)

    @pl.when(k == 0)
    def _init():
        acc_ref[...] = jnp.zeros_like(acc_ref)

    # First linear: bf16 MXU matmul, f32 accumulation.
    x = x_ref[...].astype(jnp.bfloat16)
    h = jnp.dot(x, w1_ref[...], preferred_element_type=jnp.float32)  # (tm, tk) f32
    # Bias + ReLU on the VPU in f32 (exact per d_ff chunk).
    h = jnp.maximum(h + b1_ref[...], 0.0)
    # TODO(synk): nn.Dropout is identity in eval mode; train-mode masking would
    # use pltpu.prng_seed / pltpu.prng_random_bits here.
    # Second linear: accumulate this d_ff chunk's contribution in f32.
    acc_ref[...] += jnp.dot(h.astype(jnp.bfloat16), w2_ref[...],
                            preferred_element_type=jnp.float32)

    @pl.when(k == pl.num_programs(1) - 1)
    def _store():
        o_ref[...] = (acc_ref[...] + b2_ref[...]).astype(o_ref.dtype)


# ---------------------------------------------------------------------------
# Tile planning (VMEM-budget aware, generation aware).
# ---------------------------------------------------------------------------
def _vmem_limit_bytes():
    cap = 64 * _MIB  # conservative default (v7x per-TC physical VMEM)
    try:
        info = pltpu.get_tpu_info()
        cap = int(getattr(info, "vmem_capacity_bytes", cap))
    except Exception:
        pass
    # Leave headroom for compiler-internal scratch: 48 MiB on v7x, 96 MiB on v5e/v6e.
    return min((cap * 3) // 4, 100 * _MIB)


def _est_vmem_bytes(tm, tk, d_model, kt):
    """Estimated peak VMEM for one pipelined step, including weight buffers."""
    wbuf = 1 if kt == 1 else 2                   # grid-invariant -> single buffer
    weights = wbuf * (2 * d_model * tk           # W1 chunk (bf16)
                      + 2 * tk * d_model         # W2 chunk (bf16)
                      + 4 * tk + 4 * d_model)    # biases (f32)
    acts = (2 * tm * d_model * 4                 # x tile, double-buffered (f32)
            + 2 * tm * d_model * 4               # out tile, double-buffered (f32)
            + tm * d_model * 4                   # f32 accumulator scratch
            + tm * tk * 6                        # hidden (f32 + bf16 copy)
            + tm * d_model * 2)                  # bf16 x copy
    return weights + acts


def _plan_tiles(n_rows, d_model, d_ff, vmem_limit, dff_tile=None):
    budget = int(vmem_limit * 0.8)

    # Row-tile cap: multiple of 8, and at least 2 grid steps for larger inputs
    # so v7x's two TensorCores both get work and DMA overlaps compute.
    if n_rows <= 8:
        row_cap = n_rows
    else:
        row_cap = (n_rows // 8) * 8
        if n_rows >= 256:
            row_cap = min(row_cap, max(128, (((n_rows + 1) // 2) // 128) * 128))

    if dff_tile is not None:
        tk_cands = [dff_tile]
    else:
        tk_cands = [d_ff] + [t for t in (4096, 2048, 1024, 512, 256, 128)
                             if t < d_ff and d_ff % t == 0]

    tm_cands = [t for t in (512, 384, 256, 128, 64, 32, 16, 8) if t <= row_cap]
    if not tm_cands:
        tm_cands = [row_cap]

    # Prefer the biggest MXU-friendly row tile first, then the widest d_ff chunk
    # (fully resident weights when they fit; tiled d_ff when they don't, e.g. v7x).
    for tm in tm_cands:
        for tk in tk_cands:
            kt = max(1, d_ff // tk)
            if _est_vmem_bytes(tm, tk, d_model, kt) <= budget:
                return tm, tk
    return tm_cands[-1], tk_cands[-1]


# ---------------------------------------------------------------------------
# Wrapper.
# ---------------------------------------------------------------------------
def pallas_ffn(x, w1, b1, w2, b2, *, dff_tile=None):
    """x: (..., d_model); w1: (d_model, d_ff); w2: (d_ff, d_model)."""
    orig_shape = x.shape
    d_model = orig_shape[-1]
    d_ff = w1.shape[1]
    if dff_tile is not None and d_ff % dff_tile != 0:
        raise ValueError("dff_tile must divide d_ff")

    x2d = x.reshape(-1, d_model)
    n = x2d.shape[0]

    vmem_limit = _vmem_limit_bytes()
    tm, tk = _plan_tiles(n, d_model, d_ff, vmem_limit, dff_tile)
    kt = d_ff // tk
    grid = (pl.cdiv(n, tm), kt)

    # MXU inputs in bf16 (accumulation stays f32 in-kernel); biases stay f32.
    w1b = w1.astype(jnp.bfloat16)
    w2b = w2.astype(jnp.bfloat16)
    b1f = b1.astype(jnp.float32).reshape(1, d_ff)
    b2f = b2.astype(jnp.float32).reshape(1, d_model)

    def _spec(shape, index_map, single_buffer):
        if single_buffer:  # grid-invariant -> no prefetch overlap needed
            return pl.BlockSpec(shape, index_map, pipeline_mode=pl.Buffered(1))
        return pl.BlockSpec(shape, index_map)

    weights_invariant = (kt == 1)

    out = pl.pallas_call(
        _ffn_kernel,
        out_shape=jax.ShapeDtypeStruct((n, d_model), x2d.dtype),
        grid_spec=pltpu.PrefetchScalarGridSpec(
            num_scalar_prefetch=0,
            grid=grid,
            in_specs=[
                pl.BlockSpec((tm, d_model), lambda i, k: (i, 0)),          # x rows
                _spec((d_model, tk), lambda i, k: (0, k), weights_invariant),  # W1
                _spec((1, tk), lambda i, k: (0, k), weights_invariant),        # b1
                _spec((tk, d_model), lambda i, k: (k, 0), weights_invariant),  # W2
                _spec((1, d_model), lambda i, k: (0, 0), True),                # b2
            ],
            out_specs=pl.BlockSpec((tm, d_model), lambda i, k: (i, 0)),
            scratch_shapes=[pltpu.VMEM((tm, d_model), jnp.float32)],       # f32 acc
        ),
        compiler_params=pltpu.CompilerParams(
            dimension_semantics=("parallel", "arbitrary"),
            vmem_limit_bytes=vmem_limit,
        ),
    )(x2d, w1b, b1f, w2b, b2f)

    return out.reshape(orig_shape)


# Pure-JAX reference (eval-mode dropout = identity), f32.
def _ffn_ref(x, w1, b1, w2, b2):
    h = jnp.maximum(jnp.dot(x, w1) + b1, 0.0)
    return jnp.dot(h, w2) + b2


if __name__ == "__main__":
    key = jax.random.PRNGKey(0)
    kx, kw1, kb1, kw2, kb2 = jax.random.split(key, 5)

    # Small but lane-dense (multiple-of-128) transformer-style dims.
    B, T, D_MODEL, D_FF = 2, 8, 128, 256

    x = jax.random.normal(kx, (B, T, D_MODEL), dtype=jnp.float32)
    # nn.Linear-style params, stored already transposed to (in, out).
    w1 = jax.random.normal(kw1, (D_MODEL, D_FF), dtype=jnp.float32) * 0.1
    b1 = jax.random.normal(kb1, (D_FF,), dtype=jnp.float32) * 0.1
    w2 = jax.random.normal(kw2, (D_FF, D_MODEL), dtype=jnp.float32) * 0.1
    b2 = jax.random.normal(kb2, (D_MODEL,), dtype=jnp.float32) * 0.1

    ref = _ffn_ref(x, w1, b1, w2, b2)

    # Default plan: weights fully resident, single d_ff step.
    out = jax.block_until_ready(pallas_ffn(x, w1, b1, w2, b2))
    assert out.shape == (B, T, D_MODEL)
    assert jnp.allclose(out, ref, atol=5e-2, rtol=5e-2), "mismatch (resident-weight path)"

    # Forced d_ff-tiled reduction path (exercises the k-axis accumulator, as used
    # for large d_ff on v7x).
    out_kt = jax.block_until_ready(pallas_ffn(x, w1, b1, w2, b2, dff_tile=128))
    assert jnp.allclose(out_kt, ref, atol=5e-2, rtol=5e-2), "mismatch (d_ff-tiled path)"

    print("KERNEL_OK")
</pallas_src>

<mosaic_0001>
module attributes {stable_mosaic.version = 11 : i64} {
  func.func @_ffn_kernel(%arg0: i32, %arg1: i32, %arg2: memref<16x128xf32, #tpu.memory_space<vmem>>, %arg3: memref<128x256xbf16, #tpu.memory_space<vmem>>, %arg4: memref<1x256xf32, #tpu.memory_space<vmem>>, %arg5: memref<256x128xbf16, #tpu.memory_space<vmem>>, %arg6: memref<1x128xf32, #tpu.memory_space<vmem>>, %arg7: memref<16x128xf32, #tpu.memory_space<vmem>>, %arg8: memref<16x128xf32, #tpu.memory_space<vmem>>) attributes {dimension_semantics = [#tpu.dimension_semantics<parallel>, #tpu.dimension_semantics<arbitrary>], iteration_bounds = array<i64: 1, 1>, scalar_prefetch = 0 : i64, scratch_operands = 1 : i64, tpu.core_type = #tpu.core_type<tc>, window_params = [{transform_indices = @transform_0, window_bounds = array<i64: 16, 128>}, {pipeline_mode = #tpu.pipeline_mode<synchronous>, transform_indices = @transform_1, window_bounds = array<i64: 128, 256>}, {pipeline_mode = #tpu.pipeline_mode<synchronous>, transform_indices = @transform_2, window_bounds = array<i64: 1, 256>}, {pipeline_mode = #tpu.pipeline_mode<synchronous>, transform_indices = @transform_3, window_bounds = array<i64: 256, 128>}, {pipeline_mode = #tpu.pipeline_mode<synchronous>, transform_indices = @transform_4, window_bounds = array<i64: 1, 128>}, {transform_indices = @transform_5, window_bounds = array<i64: 16, 128>}]} {
    %c0_i32 = arith.constant 0 : i32
    %0 = arith.cmpi eq, %arg1, %c0_i32 : i32
    %1 = arith.extui %0 : i1 to i32
    %c0_i32_0 = arith.constant 0 : i32
    %2 = arith.cmpi ne, %1, %c0_i32_0 : i32
    scf.if %2 {
      %cst_16 = arith.constant 0.000000e+00 : f32
      %21 = vector.broadcast %cst_16 : f32 to vector<16x128xf32>
      %c0_17 = arith.constant 0 : index
      %c0_18 = arith.constant 0 : index
      %22 = vector.load %arg8[%c0_17, %c0_18] : memref<16x128xf32, #tpu.memory_space<vmem>>, vector<16x128xf32>
      tpu.vector_store %arg8[%c0_17, %c0_18], %21 {strides = array<i32>} : memref<16x128xf32, #tpu.memory_space<vmem>>, vector<16x128xf32>,
    } else {
    }
    %c0 = arith.constant 0 : index
    %c0_1 = arith.constant 0 : index
    %3 = vector.load %arg2[%c0, %c0_1] : memref<16x128xf32, #tpu.memory_space<vmem>>, vector<16x128xf32>
    %4 = arith.truncf %3 : vector<16x128xf32> to vector<16x128xbf16>
    %c0_2 = arith.constant 0 : index
    %c0_3 = arith.constant 0 : index
    %5 = vector.load %arg3[%c0_2, %c0_3] : memref<128x256xbf16, #tpu.memory_space<vmem>>, vector<128x256xbf16>
    %cst = arith.constant dense<0.000000e+00> : vector<16x256xf32>
    %6 = tpu.matmul %4, %5, %cst {dimension_numbers = #tpu.dot_dimension_numbers<[1], [0], [0], [1], [0, 0, 1, 1], [], []>} : vector<16x128xbf16>, vector<128x256xbf16>, vector<16x256xf32> -> vector<16x256xf32>
    %c0_4 = arith.constant 0 : index
    %c0_5 = arith.constant 0 : index
    %7 = vector.load %arg4[%c0_4, %c0_5] : memref<1x256xf32, #tpu.memory_space<vmem>>, vector<1x256xf32>
    %8 = vector.broadcast %7 : vector<1x256xf32> to vector<16x256xf32>
    %9 = arith.addf %6, %8 : vector<16x256xf32>
    %cst_6 = arith.constant 0.000000e+00 : f32
    %10 = vector.broadcast %cst_6 : f32 to vector<16x256xf32>
    %11 = arith.maximumf %9, %10 : vector<16x256xf32>
    %c0_7 = arith.constant 0 : index
    %c0_8 = arith.constant 0 : index
    %12 = vector.load %arg8[%c0_7, %c0_8] : memref<16x128xf32, #tpu.memory_space<vmem>>, vector<16x128xf32>
    %13 = arith.truncf %11 : vector<16x256xf32> to vector<16x256xbf16>
    %c0_9 = arith.constant 0 : index
    %c0_10 = arith.constant 0 : index
    %14 = vector.load %arg5[%c0_9, %c0_10] : memref<256x128xbf16, #tpu.memory_space<vmem>>, vector<256x128xbf16>
    %cst_11 = arith.constant dense<0.000000e+00> : vector<16x128xf32>
    %15 = tpu.matmul %13, %14, %cst_11 {dimension_numbers = #tpu.dot_dimension_numbers<[1], [0], [0], [1], [0, 0, 1, 1], [], []>} : vector<16x256xbf16>, vector<256x128xbf16>, vector<16x128xf32> -> vector<16x128xf32>
    %16 = arith.addf %12, %15 : vector<16x128xf32>
    %c0_12 = arith.constant 0 : index
    %c0_13 = arith.constant 0 : index
    %17 = vector.load %arg8[%c0_12, %c0_13] : memref<16x128xf32, #tpu.memory_space<vmem>>, vector<16x128xf32>
    tpu.vector_store %arg8[%c0_12, %c0_13], %16 {strides = array<i32>} : memref<16x128xf32, #tpu.memory_space<vmem>>, vector<16x128xf32>,
    %c0_i32_14 = arith.constant 0 : i32
    %18 = arith.cmpi eq, %arg1, %c0_i32_14 : i32
    %19 = arith.extui %18 : i1 to i32
    %c0_i32_15 = arith.constant 0 : i32
    %20 = arith.cmpi ne, %19, %c0_i32_15 : i32
    scf.if %20 {
      %c0_16 = arith.constant 0 : index
      %c0_17 = arith.constant 0 : index
      %21 = vector.load %arg8[%c0_16, %c0_17] : memref<16x128xf32, #tpu.memory_space<vmem>>, vector<16x128xf32>
      %c0_18 = arith.constant 0 : index
      %c0_19 = arith.constant 0 : index
      %22 = vector.load %arg6[%c0_18, %c0_19] : memref<1x128xf32, #tpu.memory_space<vmem>>, vector<1x128xf32>
      %23 = vector.broadcast %22 : vector<1x128xf32> to vector<16x128xf32>
      %24 = arith.addf %21, %23 : vector<16x128xf32>
      %c0_20 = arith.constant 0 : index
      %c0_21 = arith.constant 0 : index
      %25 = vector.load %arg7[%c0_20, %c0_21] : memref<16x128xf32, #tpu.memory_space<vmem>>, vector<16x128xf32>
      tpu.vector_store %arg7[%c0_20, %c0_21], %24 {strides = array<i32>} : memref<16x128xf32, #tpu.memory_space<vmem>>, vector<16x128xf32>,
    } else {
    }
    return
  }
  func.func @transform_0(%arg0: i32, %arg1: i32) -> (i32, i32) {
    %c0_i32 = arith.constant 0 : i32
    %c0_i32_0 = arith.constant 0 : i32
    return %arg0, %c0_i32 : i32, i32
  }
  func.func @transform_1(%arg0: i32, %arg1: i32) -> (i32, i32) {
    %c0_i32 = arith.constant 0 : i32
    %c0_i32_0 = arith.constant 0 : i32
    return %c0_i32, %arg1 : i32, i32
  }
  func.func @transform_2(%arg0: i32, %arg1: i32) -> (i32, i32) {
    %c0_i32 = arith.constant 0 : i32
    %c0_i32_0 = arith.constant 0 : i32
    return %c0_i32, %arg1 : i32, i32
  }
  func.func @transform_3(%arg0: i32, %arg1: i32) -> (i32, i32) {
    %c0_i32 = arith.constant 0 : i32
    %c0_i32_0 = arith.constant 0 : i32
    return %arg1, %c0_i32 : i32, i32
  }
  func.func @transform_4(%arg0: i32, %arg1: i32) -> (i32, i32) {
    %c0_i32 = arith.constant 0 : i32
    %c0_i32_0 = arith.constant 0 : i32
    %c0_i32_1 = arith.constant 0 : i32
    return %c0_i32, %c0_i32_0 : i32, i32
  }
  func.func @transform_5(%arg0: i32, %arg1: i32) -> (i32, i32) {
    %c0_i32 = arith.constant 0 : i32
    %c0_i32_0 = arith.constant 0 : i32
    return %arg0, %c0_i32 : i32, i32
  }
}

</mosaic_0001>

<bundles_post_ra>
// kernel: tpu_custom_call.1
= control target key start
LH: loop header
LB: loop body
LE: loop exit
PB: predicated region body
PF: predicated region fallthrough
CT: control target
= control target key end

     0   :  { %10 = vsyncpa [#allocation4], 0  ;;  %s745_s0 = inlined_call_operand.hbm [shape: f32[16,128], index: 0, kind: input, shape index: {}]   ;;  %s746_s1 = inlined_call_operand.hbm [shape: bf16[128,256], index: 1, kind: input, shape index: {}]   ;;  %s747_s2 = inlined_call_operand.vmem [shape: f32[1,256], index: 2, kind: input, shape index: {}]   ;;  %s748_s3 = inlined_call_operand.hbm [shape: bf16[256,128], index: 3, kind: input, shape index: {}]   ;;  %s749_s4 = inlined_call_operand.vmem [shape: f32[1,128], index: 4, kind: input, shape index: {}]   ;;  %s750_s5 = inlined_call_operand.hbm [shape: f32[16,128], index: 5, kind: output, shape index: {}]  }
   0x1   :  { %11 = vsyncpa [#allocation7], 0 }
   0x2   :  { %12 = vsyncpa [#allocation5], 0  ;;  %s636_s18 = smov [#allocation6]   ;;  %s637_s20 = smov [#allocation3]  }
   0x3   :  { %s30_s19 = sshll.u32 %s636_s18, 4  ;;  %s18_s21 = sshll.u32 %s637_s20, 4  ;;  %s31_s19 = int_to_ptr.vmem [resolvable:$true] %s30_s19  ;;  %s675_s21 = int_to_ptr.vmem [resolvable:$true] %s18_s21 }
   0x4   :  { %s542_s24 = scalar_lea.hbm %s746_s1, 2048 }
   0x5   :  { %p543_p0 = scmp.ne.s32.totalorder %s746_s1, %s542_s24  ;;  %p546_p1 = scmp.lt.u32.totalorder %s542_s24, %s746_s1 }
   0x7   :  { %p548_p2 = pnand %p546_p1, %p543_p0 }
   0x9   :  { %551 = shalt.err (!%p548_p2)
}
   0xa   :  { %s552_s29 = scalar_lea.vmem %s31_s19, 2048  ;;  %p557_p4 = scmp.lt.s32.totalorder %s31_s19, %s31_s19 }
   0xb   :  { %p553_p3 = scmp.ne.s32.totalorder %s31_s19, %s552_s29  ;;  %p558_p5 = scmp.lt.s32.totalorder %s552_s29, %s552_s29 }
   0xd   :  { %p559_p6 = por %p558_p5, %p557_p4 }
   0xf   :  { %p560_p7 = pnand %p559_p6, %p553_p3 }
  0x11   :  { %563 = shalt.err (!%p560_p7)
}
  0x12   :  { %s638_s30 = smov 128   ;;  %s639_s6 = smov 8  }
  0x13   :  { %36 = dma.hbm_to_vmem [thread:$0]  %s746_s1, 2048, %s31_s19, [#allocation7], %s638_s30, %s638_s30, %s639_s6  }
  0x14   :  { %s564_s11 = scalar_lea.hbm %s745_s0, 256 }
  0x15   :  { %p565_p8 = scmp.ne.s32.totalorder %s745_s0, %s564_s11  ;;  %p568_p9 = scmp.lt.u32.totalorder %s564_s11, %s745_s0 }
  0x17   :  { %p570_p10 = pnand %p568_p9, %p565_p8 }
  0x19   :  { %573 = shalt.err (!%p570_p10)
}
  0x1a   :  { %s574_s16 = scalar_lea.vmem %s675_s21, 256  ;;  %p579_p12 = scmp.lt.s32.totalorder %s675_s21, %s675_s21 }
  0x1b   :  { %p575_p11 = scmp.ne.s32.totalorder %s675_s21, %s574_s16  ;;  %p580_p13 = scmp.lt.s32.totalorder %s574_s16, %s574_s16 }
  0x1d   :  { %p581_p0 = por %p580_p13, %p579_p12 }
  0x1f   :  { %p582_p1 = pnand %p581_p0, %p575_p11 }
  0x21   :  { %585 = shalt.err (!%p582_p1)
}
  0x22   :  { %24 = dma.hbm_to_vmem [thread:$0]  %s745_s0, 256, %s675_s21, [#allocation4], %s638_s30, %s638_s30, %s639_s6  }
  0x23   :  { %s640_s18 = smov [#allocation8]   ;;  %s586_s23 = scalar_lea.hbm %s748_s3, 2048 }
  0x24   :  { %s44_s19 = sshll.u32 %s640_s18, 4  ;;  %p587_p2 = scmp.ne.s32.totalorder %s748_s3, %s586_s23  ;;  %s45_s19 = int_to_ptr.vmem [resolvable:$true] %s44_s19 }
  0x25   :  { %p590_p3 = scmp.lt.u32.totalorder %s586_s23, %s748_s3 }
  0x27   :  { %p592_p4 = pnand %p590_p3, %p587_p2 }
  0x29   :  { %595 = shalt.err (!%p592_p4)
}
  0x2a   :  { %s596_s28 = scalar_lea.vmem %s45_s19, 2048  ;;  %p601_p6 = scmp.lt.s32.totalorder %s45_s19, %s45_s19 }
  0x2b   :  { %p597_p5 = scmp.ne.s32.totalorder %s45_s19, %s596_s28  ;;  %p602_p7 = scmp.lt.s32.totalorder %s596_s28, %s596_s28 }
  0x2d   :  { %p603_p8 = por %p602_p7, %p601_p6 }
  0x2f   :  { %p604_p9 = pnand %p603_p8, %p597_p5 }
  0x31   :  { %607 = shalt.err (!%p604_p9)
}
  0x32   :  { %s641_s0 = smov 64   ;;  %s642_s21 = smov 4  }
  0x33   :  { %50 = dma.hbm_to_vmem [thread:$0]  %s748_s3, 2048, %s45_s19, [#allocation7], %s641_s0, %s641_s0, %s642_s21  }
  0x34   :  { %630 = dma.done.wait [#allocation4], 256  }
  0x35   :  { %631 = vsyncadd [#allocation4], 4294967040 }
  0x36   :  { %632 = dma.done.wait [#allocation7], 4096  }
  0x37   :  { %633 = vsyncadd [#allocation7], 4294963200  ;;  %v643_v0 = vmov 0   ;;  %v502_v1 = vld [vmem:[#allocation6 + $0x4] ss:$8 sps:$4 sm:$0xff]   ;;  %v530_v16 = vld [vmem:[#allocation8 + $0x50] sm:$0xff]   ;;  %v90_v36 = vlaneseq }
  0x38   :  { %212 = vmatprep.mubr.bf16.mxu0 %v643_v0  ;;  %v504_v2 = vld [vmem:[#allocation6] ss:$8 sps:$4 sm:$0xff]   ;;  %180 = vmatprep.subr.bf16.mxu0 %v502_v1  ;;  %v505_v3 = vld [vmem:[#allocation6 + $0x14] ss:$8 sps:$4 sm:$0xff]   ;;  %v507_v4 = vld [vmem:[#allocation6 + $0x10] ss:$8 sps:$4 sm:$0xff]  }
  0x39   :  { %181 = vmatpush1.bf16.msra.mxu0 %v504_v2  ;;  %v508_v5 = vld [vmem:[#allocation6 + $0x24] ss:$8 sps:$4 sm:$0xff]   ;;  %v510_v6 = vld [vmem:[#allocation6 + $0x20] ss:$8 sps:$4 sm:$0xff]   ;;  %v511_v7 = vld [vmem:[#allocation6 + $0x34] ss:$8 sps:$4 sm:$0xff]  }
  0x3a   :  { %182 = vmatprep.subr.bf16.mxu0 %v505_v3  ;;  %v513_v8 = vld [vmem:[#allocation6 + $0x30] ss:$8 sps:$4 sm:$0xff]   ;;  %v514_v9 = vld [vmem:[#allocation6 + $0x44] ss:$8 sps:$4 sm:$0xff]   ;;  %v516_v11 = vld [vmem:[#allocation6 + $0x40] ss:$8 sps:$4 sm:$0xff]  }
  0x3b   :  { %v526_v10 = vld [vmem:[#allocation8 + $0x40] sm:$0xff]   ;;  %v517_v13 = vld [vmem:[#allocation6 + $0x54] ss:$8 sps:$4 sm:$0xff]   ;;  %v528_v14 = vld [vmem:[#allocation8 + $0x48] sm:$0xff]   ;;  %v91_v37 = vshrl.u32 %v90_v36, 7  ;;  %s644_s10 = smov [#allocation9]  }
  0x3c   :  { %v527_v12 = vld [vmem:[#allocation8] sm:$0xff]   ;;  %471 = vmatprep.subr.bf16.mxu1 %v526_v10  ;;  %v529_v15 = vld [vmem:[#allocation8 + $0x8] sm:$0xff]   ;;  %v519_v17 = vld [vmem:[#allocation6 + $0x50] ss:$8 sps:$4 sm:$0xff]   ;;  %s425_s11 = sshll.u32 %s644_s10, 4  ;;  %s426_s11 = int_to_ptr.vmem [resolvable:$true] %s425_s11 }
  0x3d   :  { %183 = vmatpush1.bf16.msra.mxu0 %v507_v4  ;;  %472 = vmatpush3.bf16.msra.mxu1 %v527_v12  ;;  %v520_v18 = vld [vmem:[#allocation6 + $0x64] ss:$8 sps:$4 sm:$0xff]   ;;  %v531_v19 = vld [vmem:[#allocation8 + $0x10] sm:$0xff]   ;;  %v532_v20 = vld [vmem:[#allocation8 + $0x58] sm:$0xff]   ;;  %v92_v38 = vsub.s32 0, %v91_v37  ;;  %v96_v40 = vsub.s32 1, %v91_v37  ;;  %p613_p11 = scmp.lt.s32.totalorder %s426_s11, %s426_s11 }
  0x3e   :  { %184 = vmatprep.subr.bf16.mxu0 %v508_v5  ;;  %473 = vmatprep.subr.bf16.mxu1 %v528_v14  ;;  %v522_v21 = vld [vmem:[#allocation6 + $0x60] ss:$8 sps:$4 sm:$0xff]   ;;  %v523_v22 = vld [vmem:[#allocation6 + $0x74] ss:$8 sps:$4 sm:$0xff]   ;;  %v525_v25 = vld [vmem:[#allocation6 + $0x70] ss:$8 sps:$4 sm:$0xff]  }
  0x3f   :  { %v533_v23 = vld [vmem:[#allocation8 + $0x18] sm:$0xff]   ;;  %v534_v24 = vld [vmem:[#allocation8 + $0x60] sm:$0xff]   ;;  %v69_v26 = vld [vmem:[#allocation3] sm:$0xff]  ;;  %s608_s12 = scalar_lea.vmem %s426_s11, 256 }
  0x40   :  { %v70_v27 = vld [vmem:[#allocation3 + $0x8] sm:$0xff]  ;;  %v535_v28 = vld [vmem:[#allocation8 + $0x20] sm:$0xff]   ;;  %v536_v29 = vld [vmem:[#allocation8 + $0x68] sm:$0xff]   ;;  %p609_p10 = scmp.ne.s32.totalorder %s426_s11, %s608_s12  ;;  %p614_p12 = scmp.lt.s32.totalorder %s608_s12, %s608_s12 }
  0x41   :  { %185 = vmatpush1.bf16.msra.mxu0 %v510_v6  ;;  %474 = vmatpush3.bf16.msra.mxu1 %v529_v15  ;;  %v71_v30 = vpack.c.bf16 %v70_v27, %v69_v26  ;;  %v537_v31 = vld [vmem:[#allocation8 + $0x28] sm:$0xff]   ;;  %v538_v32 = vld [vmem:[#allocation8 + $0x70] sm:$0xff]   ;;  %v540_v34 = vld [vmem:[#allocation8 + $0x78] sm:$0xff]  }
  0x42   :  { %186 = vmatprep.subr.bf16.mxu0 %v511_v7  ;;  %475 = vmatprep.subr.bf16.mxu1 %v530_v16  ;;  %v539_v33 = vld [vmem:[#allocation8 + $0x30] sm:$0xff]   ;;  %v541_v35 = vld [vmem:[#allocation8 + $0x38] sm:$0xff]   ;;  %p615_p13 = por %p614_p12, %p613_p11 }
  0x43   :  { %v88_v39 = vld [vmem:[%s747_s2] sm:$0x3] }
  0x44   :  { %v93_v41 = vrot.slane %v88_v39, %v92_v38  ;;  %v97_v42 = vrot.slane %v88_v39, %v96_v40  ;;  %v470_v59 = vld [vmem:[%s749_s4] ss:$0 sm:$0xff]  ;;  %p616_p0 = pnand %p615_p13, %p609_p10 }
  0x45   :  { %187 = vmatpush1.bf16.msra.mxu0 %v513_v8  ;;  %476 = vmatpush3.bf16.msra.mxu1 %v531_v19 }
  0x46   :  { %188 = vmatprep.subr.bf16.mxu0 %v514_v9  ;;  %477 = vmatprep.subr.bf16.mxu1 %v532_v20 }
  0x49   :  { %189 = vmatpush1.bf16.msra.mxu0 %v516_v11  ;;  %478 = vmatpush3.bf16.msra.mxu1 %v533_v23 }
  0x4a   :  { %190 = vmatprep.subr.bf16.mxu0 %v517_v13  ;;  %479 = vmatprep.subr.bf16.mxu1 %v534_v24 }
  0x4d   :  { %191 = vmatpush1.bf16.msra.mxu0 %v519_v17  ;;  %480 = vmatpush3.bf16.msra.mxu1 %v535_v28 }
  0x4e   :  { %192 = vmatprep.subr.bf16.mxu0 %v520_v18  ;;  %481 = vmatprep.subr.bf16.mxu1 %v536_v29 }
  0x51   :  { %193 = vmatpush1.bf16.msra.mxu0 %v522_v21  ;;  %482 = vmatpush3.bf16.msra.mxu1 %v537_v31 }
  0x52   :  { %194 = vmatprep.subr.bf16.mxu0 %v523_v22  ;;  %483 = vmatprep.subr.bf16.mxu1 %v538_v32 }
  0x55   :  { %195 = vmatpush1.bf16.msra.mxu0 %v525_v25  ;;  %484 = vmatpush3.bf16.msra.mxu1 %v539_v33 }
  0x56   :  { %485 = vmatprep.subr.bf16.mxu1 %v540_v34 }
  0x58   :  { %213 = vmatmul.mubr.bf16.vlgmr.msra.gmra.mrb[0].mxu0 %v71_v30 }
  0x59   :  { %486 = vmatpush3.bf16.msra.mxu1 %v541_v35 }
 0x12b   :  { %v214_v43 = vpop.f32.mrb[0].mxu0 }
 0x12c   :  { %v215_v44 = vadd.f32 %v214_v43, %v93_v41  ;;  %v216_v45 = vpop.f32.mrb[1].mxu0 }
 0x12d   :  { %v217_v46 = vadd.f32 %v216_v45, %v97_v42  ;;  %v218_v47 = vpop.f32.mrb[2].mxu0 }
 0x12e   :  { %v219_v48 = vadd.f32 %v218_v47, %v93_v41  ;;  %v220_v49 = vpop.f32.mrb[3].mxu0  ;;  %v223_v51 = vmax.f32 %v215_v44, 0.0 }
 0x12f   :  { %v221_v50 = vadd.f32 %v220_v49, %v97_v42  ;;  %v224_v53 = vmax.f32 %v217_v46, 0.0 }
 0x130   :  { %v225_v52 = vmax.f32 %v219_v48, 0.0 }
 0x131   :  { %v226_v54 = vmax.f32 %v221_v50, 0.0 }
 0x132   :  { %v229_v55 = vpack.c.bf16 %v225_v52, %v223_v51 }
 0x133   :  { %v230_v56 = vpack.c.bf16 %v226_v54, %v224_v53 }
 0x135   :  { %391 = vmatprep.mubr.bf16.mxu1 %v230_v56 }
 0x136   :  { %392 = vmatmul.mubr.bf16.vlgmr.msra.gmra.mrb[0].mxu1 %v229_v55 }
 0x209   :  { %v487_v57 = vpop.f32.mrb[0].mxu1 }
 0x20a   :  { %v488_v58 = vpop.f32.mrb[1].mxu1 }
 0x20b   :  { %v489_v60 = vadd.f32 %v488_v58, %v487_v57  ;;  %v490_v61 = vpop.f32.mrb[2].mxu1 }
 0x20c   :  { %v491_v62 = vpop.f32.mrb[3].mxu1 }
 0x20d   :  { %v416_v63 = vadd.f32 %v489_v60, %v470_v59  ;;  %v492_v0 = vadd.f32 %v491_v62, %v490_v61 }
 0x20f   :  { %418 = vst [vmem:[#allocation9] sm:$0xff] %v416_v63  ;;  %v417_v1 = vadd.f32 %v492_v0, %v470_v59 }
 0x211   :  { %419 = vst [vmem:[#allocation9 + $0x8] sm:$0xff] %v417_v1 }
 0x212   :  { %619 = shalt.err (!%p616_p0)
}
 0x213   :  { %s620_s14 = scalar_lea.hbm %s750_s5, 256 }
 0x214   :  { %p621_p1 = scmp.ne.s32.totalorder %s750_s5, %s620_s14  ;;  %p624_p2 = scmp.lt.u32.totalorder %s620_s14, %s750_s5 }
 0x216   :  { %p626_p3 = pnand %p624_p2, %p621_p1 }
 0x218   :  { %629 = shalt.err (!%p626_p3)
}
 0x219   :  { %431 = dma.vmem_to_hbm [thread:$0]  %s426_s11, 256, %s750_s5, [#allocation5], %s638_s30, %s638_s30, %s639_s6  }
 0x21a   :  { %634 = dma.done.wait [#allocation5], 256  }
 0x21b   :  { %635 = vsyncadd [#allocation5], 4294967040 }
 0x21c   :  { %435 = vsyncpa [#allocation4], 1 }
 0x21d   :  { %436 = vsyncpa [#allocation7], 1 }
 0x21e   :  { %437 = vsyncpa [#allocation5], 1 }

</bundles_post_ra>
